<compile_context>
chip_gen: v7x
topology: tpu7x:2x2x1
jax: 0.10.0
libtpu: 0.0.40
codegen_flags: <defaults>
</compile_context>

<pallas_src>
import functools
import math

import jax
import jax.numpy as jnp
import numpy as np
from jax import lax
from jax.experimental import pallas as pl
from jax.experimental.pallas import tpu as pltpu


def _apply_activation(y, activation):
    if activation is None:
        return y
    if activation == "relu":
        return jnp.maximum(y, 0.0)
    if activation == "softplus":
        # numerically stable softplus, kept in f32
        return jnp.maximum(y, 0.0) + jnp.log1p(jnp.exp(-jnp.abs(y)))
    if activation == "tanh":
        return jnp.tanh(y)
    raise ValueError("Activation type not recognized!")


def _round_up(x, m):
    return ((x + m - 1) // m) * m


# ---------------------------------------------------------------------------
# Fused Pallas kernel: all deconv layers + activations + max-pools in one call.
# ---------------------------------------------------------------------------
def _dcnn_fused_kernel(*refs, layer_meta, n_masks, Wc, S, activation):
    """refs = [x_canvas, w_0, ..., w_{L-1}, bias_stack, (mask_stack), out_canvas].

    Activations live on a (C_pad, S) canvas whose LANE axis is
    [image 0 | image 1 | ... | image B-1], each image a flattened (Hc, Wc) grid
    zero-padded to Sc_pad lanes.
    """
    n_layers = len(layer_meta)
    x_ref = refs[0]
    w_refs = refs[1:1 + n_layers]
    b_ref = refs[1 + n_layers]
    pos = 2 + n_layers
    mask_ref = refs[pos] if n_masks else None
    pos += 1 if n_masks else 0
    o_ref = refs[pos]

    def shifted(v, delta):
        # returns s with s[:, r] == v[:, (r + delta) % S]
        if delta == 0:
            return v
        return pltpu.roll(v, shift=(-delta) % S, axis=1)

    bias_all = b_ref[...]                               # (n_layers, max_cout_pad, 1)
    act = x_ref[0]                                      # (Cin_pad, S) f32, lane-dense
    mask_idx = 0
    for l, (ksize, sigma, pool_q, use_mask, cin_pad, cout_pad) in enumerate(layer_meta):
        # ---- stacked ConvTranspose2d operand: tap (kh,kw) needs x[ci, r - sigma*(kh*Wc+kw)].
        #      Build with a chained roll: K-1 row rolls, then K-1 rolls of the row-stack.
        row_blocks = [act]
        blk = act
        for _ in range(1, ksize):
            blk = shifted(blk, -sigma * Wc)
            row_blocks.append(blk)
        col_base = jnp.concatenate(row_blocks, axis=0)        # (K*Cin_pad, S), kh-major
        stack_blocks = [col_base]
        cb = col_base
        for _ in range(1, ksize):
            cb = shifted(cb, -sigma)
            stack_blocks.append(cb)
        x_stack = jnp.concatenate(stack_blocks, axis=0)       # (K*K*Cin_pad, S), [kw][kh][ci]

        # ---- ONE MXU matmul per layer (weights pre-laid-out to match [kw][kh][ci]) ----
        acc = jnp.dot(w_refs[l][...], x_stack, preferred_element_type=jnp.float32)
        b_col = bias_all[l]                                   # (max_cout_pad, 1)
        if b_col.shape[0] != cout_pad:
            b_col = b_col[:cout_pad]
        acc = acc + b_col                                     # broadcast over lanes
        acc = _apply_activation(acc, activation)

        if pool_q:
            # Separable MaxPool2d(q): 2*(q-1) rolls (VPU max + XLU roll only).
            row_max = acc
            for dj in range(1, pool_q):
                row_max = jnp.maximum(row_max, shifted(acc, sigma * dj))
            pooled = row_max
            for di in range(1, pool_q):
                pooled = jnp.maximum(pooled, shifted(row_max, sigma * di * Wc))
            acc = pooled

        if use_mask:
            # Zero everything off the valid (stride-sigma) sample grid + lane padding so
            # the next layer's shifted reads see proper zero padding.
            acc = acc * mask_ref[mask_idx]                    # (1, S) broadcast
            mask_idx += 1

        act = acc

    o_ref[0] = act.astype(o_ref.dtype)


# ---------------------------------------------------------------------------
# dCNN module (deterministic, in-script parameter init), PyTorch-compatible shapes
# ---------------------------------------------------------------------------
class DCNNPallas:
    def __init__(self, key, in_shape, num_conv_layers=1, kernel_sizes=(),
                 kernel_features=(), pooling_sizes=(), strides=(1,),
                 batch_norm=False, dropout=False, dropout_rate=0.5,
                 activation_type="relu", last_pad=False, max_batch_tile=16):
        if activation_type not in ("relu", "softplus", "tanh", None):
            raise ValueError("Activation type not recognized!")
        if batch_norm:
            # TODO(synk): training-mode BatchNorm2d (batch statistics) not implemented.
            raise NotImplementedError("batch_norm=True path not implemented")
        if last_pad:
            # TODO(synk): output_padding (only legal with stride > 1) not implemented.
            raise NotImplementedError("last_pad=True path not implemented")
        for l in range(num_conv_layers):
            if strides[l] != 1:
                # TODO(synk): fractional-stride (input-dilated) ConvTranspose2d not implemented.
                raise NotImplementedError("only stride=1 ConvTranspose2d is supported")
        # (dropout / dropout_rate are accepted but unused, matching the reference module.)

        self.activation = activation_type
        self.strides = tuple(strides)
        self.pooling_sizes = tuple(pooling_sizes)
        self.max_batch_tile = int(max_batch_tile)

        # --- parameters (PyTorch ConvTranspose2d layout: (Cin, Cout, K, K)) ---
        params = []
        cin = in_shape[0]
        for l in range(num_conv_layers):
            cout = kernel_features[l]
            k = kernel_sizes[l]
            key, wk, bk = jax.random.split(key, 3)
            bound = 1.0 / math.sqrt(cout * k * k)
            w = jax.random.uniform(wk, (cin, cout, k, k), jnp.float32, -bound, bound)
            b = jax.random.uniform(bk, (cout,), jnp.float32, -bound, bound)
            params.append((w, b))
            cin = cout
        self.params = params

        # --- static schedule: canvas size, per-layer sampling stride, validity masks ---
        _, H, W = in_shape
        sigma = 1
        Hc = Wc = 0
        Hl, Wl = H, W
        cin_pad = _round_up(in_shape[0], 8)           # f32 sublane tile
        self.c0_pad = cin_pad
        layer_meta = []
        mask_specs = []
        wrap_checks = []
        for l in range(num_conv_layers):
            k = kernel_sizes[l]
            p = k - 1
            cout_pad = _round_up(kernel_features[l], 8)
            Hc = max(Hc, sigma * (Hl + p))
            Wc = max(Wc, sigma * (Wl + p))
            h_in, w_in = Hl, Wl
            Hl, Wl = Hl + p, Wl + p                   # deconv output size (stride 1)
            q = pooling_sizes[l] if len(pooling_sizes) >= l + 1 else 0
            meta_sigma = sigma
            if q:
                Hl, Wl = Hl // q, Wl // q             # MaxPool2d floor mode
                sigma *= q
            use_mask = l != num_conv_layers - 1       # last layer: wrapper crops instead
            layer_meta.append((k, meta_sigma, q, use_mask, cin_pad, cout_pad))
            wrap_checks.append((meta_sigma, h_in, w_in, k, q, Hl, Wl))
            if use_mask:
                mask_specs.append((sigma, Hl, Wl))
            cin_pad = cout_pad

        self.Hc, self.Wc = Hc, Wc
        self.Sc = Hc * Wc
        self.Sc_pad = _round_up(self.Sc, 128)         # lane-dense canvas width
        self.layer_meta = tuple(layer_meta)
        self.final_sigma = sigma
        self.final_hw = (Hl, Wl)
        self.c_last_pad = layer_meta[-1][5]
        self.out_shape = (kernel_features[num_conv_layers - 1], Hl, Wl)
        self.out_size = int(np.prod(self.out_shape))

        # Circular-roll wrap safety: backward conv reads must land on the previous
        # image's zero tail; pool wrap may only pollute positions that are later
        # masked/cropped.  (Holds for the batch-on-lanes layout and the B=1 case alike.)
        for (s, h_in, w_in, k, q, h_out, w_out) in wrap_checks:
            reach = s * ((h_in + k - 2) * Wc + (w_in + k - 2))
            assert reach < self.Sc_pad, "deconv roll-wrap would read non-zero data"
            if q:
                kept_max = s * q * ((h_out - 1) * Wc + (w_out - 1))
                delta_max = s * (q - 1) * (Wc + 1)
                assert kept_max + delta_max < self.Sc_pad, \
                    "max-pool roll-wrap would pollute a kept position"

        # --- host-side parameter layout for the kernel ---
        # Weights: (Cout_pad, K*K*Cin_pad), columns ordered [kw][kh][ci] to match the
        # roll-chained stacked operand built in-kernel.
        w2d = []
        max_cout_pad = max(m[5] for m in layer_meta)
        b_rows = []
        for l, (w, b) in enumerate(params):
            ci, co, k, _ = w.shape
            cin_pad_l, cout_pad_l = layer_meta[l][4], layer_meta[l][5]
            wt = jnp.transpose(w, (1, 3, 2, 0))                     # (Cout, Kw, Kh, Cin)
            wt = jnp.pad(wt, ((0, cout_pad_l - co), (0, 0), (0, 0), (0, cin_pad_l - ci)))
            w2d.append(wt.reshape(cout_pad_l, k * k * cin_pad_l))
            b_rows.append(jnp.pad(b, (0, max_cout_pad - co)))
        self.w2d = w2d
        self.b_stack = jnp.stack(b_rows).reshape(num_conv_layers, max_cout_pad, 1)

        # Validity masks: ones on the stride-sigma sample grid, zeros elsewhere
        # (including the Sc..Sc_pad lane padding).
        masks = []
        for (s, hv, wv) in mask_specs:
            m = np.zeros((Hc, Wc), np.float32)
            m[0:s * hv:s, 0:s * wv:s] = 1.0
            masks.append(np.pad(m.reshape(-1), (0, self.Sc_pad - self.Sc)))
        self.masks_base = (jnp.asarray(np.stack(masks)[:, None, :])  # (n_masks,1,Sc_pad)
                           if masks else None)

        self._forward = jax.jit(self._forward_impl)

    def _forward_impl(self, x):
        N, Cin, H, W = x.shape
        Hc, Wc, Sc, Sp = self.Hc, self.Wc, self.Sc, self.Sc_pad
        c0_pad = self.c0_pad
        c_last, hf, wf = self.out_shape
        c_last_pad = self.c_last_pad

        # Batch tile: amortize per-grid-step overhead + merge DMAs, but keep >= 2 grid
        # steps when N >= 2 so v7x's two TensorCores both get work (parallel grid axis).
        B = min(self.max_batch_tile, max(1, N // 2)) if N >= 2 else 1
        G = pl.cdiv(N, B)
        Np = G * B
        S = B * Sp

        # Input canvas: zero-pad batch/channels/spatial, flatten spatial onto lanes,
        # pad lanes to a multiple of 128, fold the B-image tile onto the lane axis.
        xc = jnp.pad(x.astype(jnp.float32),
                     ((0, Np - N), (0, c0_pad - Cin), (0, Hc - H), (0, Wc - W)))
        xc = jnp.pad(xc.reshape(Np, c0_pad, Sc), ((0, 0), (0, 0), (0, Sp - Sc)))
        xc = xc.reshape(G, B, c0_pad, Sp).transpose(0, 2, 1, 3).reshape(G, c0_pad, S)

        inputs = [xc]
        in_specs = [pl.BlockSpec((1, c0_pad, S), lambda g: (g, 0, 0))]
        for w in self.w2d:
            inputs.append(w)
            in_specs.append(pl.BlockSpec(w.shape, lambda g: (0, 0)))
        inputs.append(self.b_stack)
        in_specs.append(pl.BlockSpec(self.b_stack.shape, lambda g: (0, 0, 0)))
        n_masks = 0
        if self.masks_base is not None:
            n_masks = self.masks_base.shape[0]
            mstack = jnp.tile(self.masks_base, (1, 1, B))            # (n_masks, 1, S)
            inputs.append(mstack)
            in_specs.append(pl.BlockSpec((n_masks, 1, S), lambda g: (0, 0, 0)))

        # Advisory cost estimate, scaled by the padded batch.
        flops = 0
        trans = 0
        for (k, _, _, _, ci_p, co_p) in self.layer_meta:
            flops += 2 * k * k * ci_p * co_p * Sp
            if self.activation in ("softplus", "tanh"):
                trans += co_p * Sp
        flops *= Np
        trans *= Np
        bytes_accessed = (Np * (c0_pad + c_last_pad) * Sp * 4
                          + sum(int(w.size) for w in self.w2d) * 4
                          + int(self.b_stack.size) * 4
                          + n_masks * S * 4)

        kernel = functools.partial(
            _dcnn_fused_kernel, layer_meta=self.layer_meta, n_masks=n_masks,
            Wc=Wc, S=S, activation=self.activation)

        out = pl.pallas_call(
            kernel,
            out_shape=jax.ShapeDtypeStruct((G, c_last_pad, S), jnp.float32),
            grid=(G,),
            in_specs=in_specs,
            out_specs=pl.BlockSpec((1, c_last_pad, S), lambda g: (g, 0, 0)),
            compiler_params=pltpu.CompilerParams(
                dimension_semantics=("parallel",)),
            cost_estimate=pl.CostEstimate(
                flops=flops, transcendentals=trans, bytes_accessed=bytes_accessed),
        )(*inputs)

        # Unfold batch from lanes, crop valid channels / stride-sigma samples -> NCHW.
        out = out.reshape(G, c_last_pad, B, Sp).transpose(0, 2, 1, 3)
        out = out.reshape(Np, c_last_pad, Sp)[:N, :c_last, :Sc]
        out = out.reshape(N, c_last, Hc, Wc)
        sf = self.final_sigma
        return out[:, :, 0:sf * hf:sf, 0:sf * wf:sf]

    def __call__(self, x):
        return self._forward(x)


# ---------------------------------------------------------------------------
# Pure-JAX (XLA) reference of the same forward pass (NCHW), for validation.
# ---------------------------------------------------------------------------
def reference_forward(model, x):
    for l, (w, b) in enumerate(model.params):
        k = w.shape[-1]
        s = model.strides[l]
        # ConvTranspose2d == conv with swapped+flipped kernel, full padding, lhs dilation.
        w_conv = jnp.flip(jnp.transpose(w, (1, 0, 2, 3)), axis=(-2, -1))  # (Cout, Cin, K, K)
        x = lax.conv_general_dilated(
            x, w_conv, window_strides=(1, 1),
            padding=[(k - 1, k - 1), (k - 1, k - 1)],
            lhs_dilation=(s, s),
            dimension_numbers=("NCHW", "OIHW", "NCHW"),
            precision=lax.Precision.HIGHEST)
        x = x + b.reshape(1, -1, 1, 1)
        x = _apply_activation(x, model.activation)
        if len(model.pooling_sizes) >= l + 1:
            q = model.pooling_sizes[l]
            x = lax.reduce_window(x, -jnp.inf, lax.max,
                                  (1, 1, q, q), (1, 1, q, q), "VALID")
    return x


if __name__ == "__main__":
    key = jax.random.PRNGKey(0)
    kparam, kx = jax.random.split(key)

    in_shape = (4, 16, 16)  # (C, H, W)
    model = DCNNPallas(
        kparam, in_shape,
        num_conv_layers=2,
        kernel_sizes=(3, 3),
        kernel_features=(8, 16),
        pooling_sizes=(2,),       # pool only after the first deconv layer
        strides=(1, 1),
        batch_norm=False,
        activation_type="relu",
    )

    x = jax.random.normal(kx, (2, *in_shape), jnp.float32)  # NCHW, batch=2

    y = jax.block_until_ready(model(x))
    y_ref = jax.block_until_ready(reference_forward(model, x))

    # ConvT(3): 16 -> 18, MaxPool(2): -> 9, ConvT(3): 9 -> 11
    assert y.shape == (2, 16, 11, 11), y.shape
    if not jnp.allclose(y, y_ref, atol=1e-4, rtol=1e-4):
        err = float(jnp.max(jnp.abs(y - y_ref)))
        raise AssertionError(
            f"Pallas dCNN output does not match JAX reference (max abs err {err})")

    print("KERNEL_OK")
</pallas_src>

<mosaic_0001>
module attributes {stable_mosaic.version = 11 : i64} {
  func.func @_dcnn_fused_kernel(%arg0: i32, %arg1: memref<1x8x512xf32, #tpu.memory_space<vmem>>, %arg2: memref<8x72xf32, #tpu.memory_space<vmem>>, %arg3: memref<16x72xf32, #tpu.memory_space<vmem>>, %arg4: memref<2x16x1xf32, #tpu.memory_space<vmem>>, %arg5: memref<1x1x512xf32, #tpu.memory_space<vmem>>, %arg6: memref<1x16x512xf32, #tpu.memory_space<vmem>>) attributes {dimension_semantics = [#tpu.dimension_semantics<parallel>], iteration_bounds = array<i64: 2>, scalar_prefetch = 0 : i64, scratch_operands = 0 : i64, tpu.core_type = #tpu.core_type<tc>, window_params = [{transform_indices = @transform_0, window_bounds = array<i64: 1, 8, 512>}, {pipeline_mode = #tpu.pipeline_mode<synchronous>, transform_indices = @transform_1, window_bounds = array<i64: 8, 72>}, {pipeline_mode = #tpu.pipeline_mode<synchronous>, transform_indices = @transform_2, window_bounds = array<i64: 16, 72>}, {pipeline_mode = #tpu.pipeline_mode<synchronous>, transform_indices = @transform_3, window_bounds = array<i64: 2, 16, 1>}, {pipeline_mode = #tpu.pipeline_mode<synchronous>, transform_indices = @transform_4, window_bounds = array<i64: 1, 1, 512>}, {transform_indices = @transform_5, window_bounds = array<i64: 1, 16, 512>}]} {
    %c0 = arith.constant 0 : index
    %c0_0 = arith.constant 0 : index
    %c0_1 = arith.constant 0 : index
    %0 = vector.load %arg4[%c0, %c0_0, %c0_1] : memref<2x16x1xf32, #tpu.memory_space<vmem>>, vector<2x16x1xf32>
    %c0_2 = arith.constant 0 : index
    %c0_3 = arith.constant 0 : index
    %c0_4 = arith.constant 0 : index
    %1 = vector.load %arg1[%c0_2, %c0_3, %c0_4] : memref<1x8x512xf32, #tpu.memory_space<vmem>>, vector<1x8x512xf32>
    %2 = vector.shape_cast %1 : vector<1x8x512xf32> to vector<8x512xf32>
    %c22_i32 = arith.constant 22 : i32
    %3 = tpu.dynamic_rotate %2 by %c22_i32 dim 1 : vector<8x512xf32>, i32 -> vector<8x512xf32>
    %c22_i32_5 = arith.constant 22 : i32
    %4 = tpu.dynamic_rotate %3 by %c22_i32_5 dim 1 : vector<8x512xf32>, i32 -> vector<8x512xf32>
    %5 = tpu.concatenate %2, %3, %4 in 0 : vector<8x512xf32>, vector<8x512xf32>, vector<8x512xf32> -> vector<24x512xf32>
    %c1_i32 = arith.constant 1 : i32
    %6 = tpu.dynamic_rotate %5 by %c1_i32 dim 1 : vector<24x512xf32>, i32 -> vector<24x512xf32>
    %c1_i32_6 = arith.constant 1 : i32
    %7 = tpu.dynamic_rotate %6 by %c1_i32_6 dim 1 : vector<24x512xf32>, i32 -> vector<24x512xf32>
    %8 = tpu.concatenate %5, %6, %7 in 0 : vector<24x512xf32>, vector<24x512xf32>, vector<24x512xf32> -> vector<72x512xf32>
    %c0_7 = arith.constant 0 : index
    %c0_8 = arith.constant 0 : index
    %9 = vector.load %arg2[%c0_7, %c0_8] : memref<8x72xf32, #tpu.memory_space<vmem>>, vector<8x72xf32>
    %cst = arith.constant dense<0.000000e+00> : vector<8x512xf32>
    %10 = tpu.matmul %9, %8, %cst {dimension_numbers = #tpu.dot_dimension_numbers<[1], [0], [0], [1], [0, 0, 1, 1], [], []>} : vector<8x72xf32>, vector<72x512xf32>, vector<8x512xf32> -> vector<8x512xf32>
    %11 = vector.extract_strided_slice %0 {offsets = [0, 0, 0], sizes = [1, 16, 1], strides = [1, 1, 1]} : vector<2x16x1xf32> to vector<1x16x1xf32>
    %12 = vector.shape_cast %11 : vector<1x16x1xf32> to vector<16x1xf32>
    %13 = vector.extract_strided_slice %12 {offsets = [0, 0], sizes = [8, 1], strides = [1, 1]} : vector<16x1xf32> to vector<8x1xf32>
    %14 = vector.broadcast %13 : vector<8x1xf32> to vector<8x512xf32>
    %15 = arith.addf %10, %14 : vector<8x512xf32>
    %cst_9 = arith.constant 0.000000e+00 : f32
    %16 = vector.broadcast %cst_9 : f32 to vector<8x512xf32>
    %17 = arith.maximumf %15, %16 : vector<8x512xf32>
    %c511_i32 = arith.constant 511 : i32
    %18 = tpu.dynamic_rotate %17 by %c511_i32 dim 1 : vector<8x512xf32>, i32 -> vector<8x512xf32>
    %19 = arith.maximumf %17, %18 : vector<8x512xf32>
    %c490_i32 = arith.constant 490 : i32
    %20 = tpu.dynamic_rotate %19 by %c490_i32 dim 1 : vector<8x512xf32>, i32 -> vector<8x512xf32>
    %21 = arith.maximumf %19, %20 : vector<8x512xf32>
    %c0_10 = arith.constant 0 : index
    %c0_11 = arith.constant 0 : index
    %c0_12 = arith.constant 0 : index
    %22 = vector.load %arg5[%c0_10, %c0_11, %c0_12] : memref<1x1x512xf32, #tpu.memory_space<vmem>>, vector<1x1x512xf32>
    %23 = vector.shape_cast %22 : vector<1x1x512xf32> to vector<1x512xf32>
    %24 = vector.broadcast %23 : vector<1x512xf32> to vector<8x512xf32>
    %25 = arith.mulf %21, %24 : vector<8x512xf32>
    %c44_i32 = arith.constant 44 : i32
    %26 = tpu.dynamic_rotate %25 by %c44_i32 dim 1 : vector<8x512xf32>, i32 -> vector<8x512xf32>
    %c44_i32_13 = arith.constant 44 : i32
    %27 = tpu.dynamic_rotate %26 by %c44_i32_13 dim 1 : vector<8x512xf32>, i32 -> vector<8x512xf32>
    %28 = tpu.concatenate %25, %26, %27 in 0 : vector<8x512xf32>, vector<8x512xf32>, vector<8x512xf32> -> vector<24x512xf32>
    %c2_i32 = arith.constant 2 : i32
    %29 = tpu.dynamic_rotate %28 by %c2_i32 dim 1 : vector<24x512xf32>, i32 -> vector<24x512xf32>
    %c2_i32_14 = arith.constant 2 : i32
    %30 = tpu.dynamic_rotate %29 by %c2_i32_14 dim 1 : vector<24x512xf32>, i32 -> vector<24x512xf32>
    %31 = tpu.concatenate %28, %29, %30 in 0 : vector<24x512xf32>, vector<24x512xf32>, vector<24x512xf32> -> vector<72x512xf32>
    %c0_15 = arith.constant 0 : index
    %c0_16 = arith.constant 0 : index
    %32 = vector.load %arg3[%c0_15, %c0_16] : memref<16x72xf32, #tpu.memory_space<vmem>>, vector<16x72xf32>
    %cst_17 = arith.constant dense<0.000000e+00> : vector<16x512xf32>
    %33 = tpu.matmul %32, %31, %cst_17 {dimension_numbers = #tpu.dot_dimension_numbers<[1], [0], [0], [1], [0, 0, 1, 1], [], []>} : vector<16x72xf32>, vector<72x512xf32>, vector<16x512xf32> -> vector<16x512xf32>
    %34 = vector.extract_strided_slice %0 {offsets = [1, 0, 0], sizes = [1, 16, 1], strides = [1, 1, 1]} : vector<2x16x1xf32> to vector<1x16x1xf32>
    %35 = vector.shape_cast %34 : vector<1x16x1xf32> to vector<16x1xf32>
    %36 = vector.broadcast %35 : vector<16x1xf32> to vector<16x512xf32>
    %37 = arith.addf %33, %36 : vector<16x512xf32>
    %cst_18 = arith.constant 0.000000e+00 : f32
    %38 = vector.broadcast %cst_18 : f32 to vector<16x512xf32>
    %39 = arith.maximumf %37, %38 : vector<16x512xf32>
    %c0_19 = arith.constant 0 : index
    %c0_20 = arith.constant 0 : index
    %c0_21 = arith.constant 0 : index
    %40 = vector.load %arg6[%c0_19, %c0_20, %c0_21] : memref<1x16x512xf32, #tpu.memory_space<vmem>>, vector<1x16x512xf32>
    %41 = vector.shape_cast %40 : vector<1x16x512xf32> to vector<16x512xf32>
    %42 = vector.shape_cast %39 : vector<16x512xf32> to vector<1x16x512xf32>
    tpu.vector_store %arg6[%c0_19, %c0_20, %c0_21], %42 {strides = array<i32>} : memref<1x16x512xf32, #tpu.memory_space<vmem>>, vector<1x16x512xf32>,
    return
  }
  func.func @transform_0(%arg0: i32) -> (i32, i32, i32) {
    %c0_i32 = arith.constant 0 : i32
    %c0_i32_0 = arith.constant 0 : i32
    %c0_i32_1 = arith.constant 0 : i32
    return %arg0, %c0_i32, %c0_i32_0 : i32, i32, i32
  }
  func.func @transform_1(%arg0: i32) -> (i32, i32) {
    %c0_i32 = arith.constant 0 : i32
    %c0_i32_0 = arith.constant 0 : i32
    %c0_i32_1 = arith.constant 0 : i32
    return %c0_i32, %c0_i32_0 : i32, i32
  }
  func.func @transform_2(%arg0: i32) -> (i32, i32) {
    %c0_i32 = arith.constant 0 : i32
    %c0_i32_0 = arith.constant 0 : i32
    %c0_i32_1 = arith.constant 0 : i32
    return %c0_i32, %c0_i32_0 : i32, i32
  }
  func.func @transform_3(%arg0: i32) -> (i32, i32, i32) {
    %c0_i32 = arith.constant 0 : i32
    %c0_i32_0 = arith.constant 0 : i32
    %c0_i32_1 = arith.constant 0 : i32
    %c0_i32_2 = arith.constant 0 : i32
    return %c0_i32, %c0_i32_0, %c0_i32_1 : i32, i32, i32
  }
  func.func @transform_4(%arg0: i32) -> (i32, i32, i32) {
    %c0_i32 = arith.constant 0 : i32
    %c0_i32_0 = arith.constant 0 : i32
    %c0_i32_1 = arith.constant 0 : i32
    %c0_i32_2 = arith.constant 0 : i32
    return %c0_i32, %c0_i32_0, %c0_i32_1 : i32, i32, i32
  }
  func.func @transform_5(%arg0: i32) -> (i32, i32, i32) {
    %c0_i32 = arith.constant 0 : i32
    %c0_i32_0 = arith.constant 0 : i32
    %c0_i32_1 = arith.constant 0 : i32
    return %arg0, %c0_i32, %c0_i32_0 : i32, i32, i32
  }
}

</mosaic_0001>

<bundles_post_ra>
// kernel: _forward_impl.1
= control target key start
LH: loop header
LB: loop body
LE: loop exit
PB: predicated region body
PF: predicated region fallthrough
CT: control target
= control target key end

     0   :  { %s1116_s18 = smov 0   ;;  %s1356_s0 = inlined_call_operand.vmem [shape: f32[2,8,512], index: 0, kind: input, shape index: {}]   ;;  %s1357_s1 = inlined_call_operand.vmem [shape: f32[8,72], index: 1, kind: input, shape index: {}]   ;;  %s1358_s2 = inlined_call_operand.vmem [shape: f32[16,72], index: 2, kind: input, shape index: {}]   ;;  %s1359_s3 = inlined_call_operand.vmem [shape: f32[2,16,1], index: 3, kind: input, shape index: {}]   ;;  %s1360_s4 = inlined_call_operand.vmem [shape: f32[1,1,512], index: 4, kind: input, shape index: {}]   ;;  %s1361_s5 = inlined_call_operand.vmem [shape: f32[2,16,512], index: 5, kind: output, shape index: {}]  }
   0x1 LB: > { %s889_s19 = sadd.s32 4294967295, %s1076_s18   ;;  %p893_p0 = scmp.ge.s32.totalorder %s1076_s18, 1  ;;  %s1076_s18 = sphi %s1116_s18, %s15_s18  }
   0x2   : > { %p187_p1 = scmp.lt.s32.totalorder %s1076_s18, 3 }
   0x4   : > { %p188_p2 = pnand %p893_p0, %p187_p1 }
   0x5   : > { %p215_p3 = scmp.lt.s32.totalorder (!%p188_p2), %s889_s19, 1  ;;  %s1078_s24 = smov (!%p188_p2), 22   ;;  %v240_v4 = vlaneseq (!%p188_p2)  ;;  %v1080_v58 = vmov (!%p188_p2), 0.0   ;;  %v1081_v60 = vmov (!%p188_p2), 0   ;;  %vm338_vm2 = vcmask (!%p188_p2), 588800  }
   0x6   : > { %191 = sbr.rel (%p188_p2) target bundleno = 1656 (0x678), region = 40  ;;  %s1079_s25 = smov (!%p188_p2), 1   ;;  %406 = vmatprep.mubr.f32.mxu0 (!%p188_p2), %v1080_v58  ;;  %477 = vmatprep.mubr.f32.mxu1 (!%p188_p2), %v1080_v58 }
   0x7   : > { %v1131_v5 = vand.u32 (!%p188_p2), 127, %v240_v4  ;;  %1028 = vset.pattern.permute.xlu0 (!%p188_p2), %v1081_v60  ;;  %1069 = vset.pattern.permute.xlu1 (!%p188_p2), %v1081_v60  ;;  %s1082_s30 = smov (!%p188_p2), 127   ;;  %s1083_s6 = smov (!%p188_p2), 106  }
   0x8   : > { %s1084_s9 = smov (!%p188_p2), 44   ;;  %s1085_s10 = smov (!%p188_p2), 2  }
   0x9   : > { %vm242_vm0 = vcmp.lt.s32.totalorder (!%p188_p2), %v1131_v5, 22  ;;  %vm283_vm1 = vcmp.lt.s32.totalorder (!%p188_p2), %v1131_v5, 1  ;;  %vm496_vm3 = vcmp.lt.s32.totalorder (!%p188_p2), %v1131_v5, 127  ;;  %vm513_vm4 = vcmp.lt.s32.totalorder (!%p188_p2), %v1131_v5, 106 }
   0xa   : > { %vm556_vm5 = vcmp.lt.s32.totalorder (!%p188_p2), %v1131_v5, 44  ;;  %vm597_vm6 = vcmp.lt.s32.totalorder (!%p188_p2), %v1131_v5, 2 }
   0xd   : > { %s1363_s19 = smov (!%p215_p3, %s889_s19), 1 }
   0xe   : > { %s906_s20 = sshll.u32 %s1363_s19, 5  ;;  %s907_s21 = sshll.u32 %s1363_s19, 6 }
   0xf   : > { %s219_s23 = scalar_lea.vmem %s1356_s0, %s906_s20 }
  0x10   : > { %v230_v0 = vld [vmem:[%s219_s23 + $0x10] sm:$0xff]  ;;  %v228_v1 = vld [vmem:[%s219_s23] sm:$0xff]  ;;  %v231_v2 = vld [vmem:[%s219_s23 + $0x18] sm:$0xff] }
  0x11   : > { %236 = vrot.lane.b32.xlu1 %v230_v0, %s1078_s24  ;;  %232 = vrot.lane.b32.xlu0 %v228_v1, %s1078_s24  ;;  %v229_v3 = vld [vmem:[%s219_s23 + $0x8] sm:$0xff] }
  0x15   : > { %238 = vrot.lane.b32.xlu1 %v231_v2, %s1078_s24  ;;  %234 = vrot.lane.b32.xlu0 %v229_v3, %s1078_s24 }
  0x83   : > { %v237_v6 = vpop.permute.xlu1 %236  ;;  %v233_v7 = vpop.permute.xlu0 %232 }
  0x87   : > { %v239_v8 = vpop.permute.xlu1 %238  ;;  %v235_v9 = vpop.permute.xlu0 %234 }
  0x88   : > { %v243_v10 = vsel %vm242_vm0, %v237_v6, %v239_v8  ;;  %v244_v11 = vsel %vm242_vm0, %v235_v9, %v237_v6  ;;  %v246_v12 = vsel %vm242_vm0, %v239_v8, %v233_v7  ;;  %v245_v13 = vsel %vm242_vm0, %v233_v7, %v235_v9 }
  0x89   : > { %247 = vrot.lane.b32.xlu0 %v246_v12, %s1078_s24  ;;  %249 = vrot.lane.b32.xlu1 %v245_v13, %s1078_s24  ;;  %v908_v14 = vpack.c.bf16 %v245_v13, %v229_v3  ;;  %v924_v15 = vpack.c.bf16 %v243_v10, %v231_v2  ;;  %v910_v16 = vpack.c.bf16 %v246_v12, %v228_v1 }
  0x8a   : > { %v926_v17 = vpack.c.bf16 %v244_v11, %v230_v0  ;;  %v993_v18 = vpack.i.bf16 %v245_v13, %v229_v3  ;;  %v988_v19 = vpack.i.bf16 %v246_v12, %v228_v1  ;;  %v1003_v20 = vpack.i.bf16 %v243_v10, %v231_v2 }
  0x8b   : > { %909 = vmatprep.subr.bf16.mxu0 %v908_v14  ;;  %925 = vmatprep.subr.bf16.mxu1 %v924_v15  ;;  %v998_v21 = vpack.i.bf16 %v244_v11, %v230_v0 }
  0x8c   : > { %911 = vmatpush1.bf16.msra.mxu0 %v910_v16  ;;  %927 = vmatpush1.bf16.msra.mxu1 %v926_v17 }
  0x8d   : > { %253 = vrot.lane.b32.xlu1 %v243_v10, %s1078_s24  ;;  %251 = vrot.lane.b32.xlu0 %v244_v11, %s1078_s24  ;;  %v225_v10 = vld [vmem:[%s1359_s3] sm:$0xff]  ;;  %s224_s24 = scalar_lea.vmem %s1361_s5, %s907_s21 }
  0x91   : > { %994 = vrot.lane.b32.xlu1 %v993_v18, %s1079_s25  ;;  %989 = vrot.lane.b32.xlu0 %v988_v19, %s1079_s25 }
  0x95   : > { %1004 = vrot.lane.b32.xlu1 %v1003_v20, %s1079_s25  ;;  %999 = vrot.lane.b32.xlu0 %v998_v21, %s1079_s25 }
  0xfb   : > { %v250_v22 = vpop.permute.xlu1 %249  ;;  %v248_v23 = vpop.permute.xlu0 %247 }
  0xfc   : > { %v257_v24 = vsel %vm242_vm0, %v248_v23, %v250_v22 }
  0xfd   : > { %269 = vrot.lane.b32.xlu1 %v257_v24, %s1079_s25 }
  0xff   : > { %v254_v25 = vpop.permute.xlu1 %253  ;;  %v252_v26 = vpop.permute.xlu0 %251 }
 0x100   : > { %v258_v27 = vsel %vm242_vm0, %v254_v25, %v248_v23  ;;  %v255_v28 = vsel %vm242_vm0, %v252_v26, %v254_v25  ;;  %v256_v31 = vsel %vm242_vm0, %v250_v22, %v252_v26 }
 0x101   : > { %263 = vrot.lane.b32.xlu0 %v258_v27, %s1079_s25  ;;  %281 = vrot.lane.b32.xlu1 %v255_v28, %s1079_s25 }
 0x103   : > { %v995_v29 = vpop.permute.xlu1 %994  ;;  %v990_v30 = vpop.permute.xlu0 %989 }
 0x104   : > { %v997_v32 = vunpack.i.h.bf16 %v995_v29  ;;  %v996_v33 = vunpack.i.l.bf16 %v995_v29  ;;  %v992_v34 = vunpack.i.h.bf16 %v990_v30  ;;  %v991_v35 = vunpack.i.l.bf16 %v990_v30 }
 0x105   : > { %275 = vrot.lane.b32.xlu0 %v256_v31, %s1079_s25 }
 0x106   : > { %v290_v36 = vsel %vm283_vm1, %v991_v35, %v996_v33  ;;  %v291_v37 = vsel %vm283_vm1, %v992_v34, %v997_v32 }
 0x107   : > { %v1005_v38 = vpop.permute.xlu1 %1004  ;;  %v1000_v39 = vpop.permute.xlu0 %999  ;;  %v1013_v40 = vpack.i.bf16 %v291_v37, %v290_v36  ;;  %v912_v41 = vpack.c.bf16 %v290_v36, %v257_v24 }
 0x108   : > { %v1007_v42 = vunpack.i.h.bf16 %v1005_v38  ;;  %v1006_v43 = vunpack.i.l.bf16 %v1005_v38  ;;  %v1002_v44 = vunpack.i.h.bf16 %v1000_v39  ;;  %v1001_v45 = vunpack.i.l.bf16 %v1000_v39 }
 0x109   : > { %1014 = vrot.lane.b32.xlu1 %v1013_v40, %s1079_s25  ;;  %913 = vmatprep.subr.bf16.mxu0 %v912_v41  ;;  %v332_v40 = vld [vmem:[%s1357_s1] sm:$0xff] }
 0x10a   : > { %v284_v46 = vsel %vm283_vm1, %v1001_v45, %v1006_v43  ;;  %v293_v47 = vsel %vm283_vm1, %v1006_v43, %v991_v35  ;;  %v294_v48 = vsel %vm283_vm1, %v1007_v42, %v992_v34  ;;  %v285_v49 = vsel %vm283_vm1, %v1002_v44, %v1007_v42 }
 0x10b   : > { %v928_v50 = vpack.c.bf16 %v284_v46, %v255_v28  ;;  %v1008_v51 = vpack.i.bf16 %v294_v48, %v293_v47  ;;  %v1023_v52 = vpack.i.bf16 %v285_v49, %v284_v46  ;;  %v914_v53 = vpack.c.bf16 %v293_v47, %v258_v27 }
 0x10c   : > { %v287_v54 = vsel %vm283_vm1, %v996_v33, %v1001_v45  ;;  %v288_v55 = vsel %vm283_vm1, %v997_v32, %v1002_v44 }
 0x10d   : > { %929 = vmatprep.subr.bf16.mxu1 %v928_v50  ;;  %1009 = vrot.lane.b32.xlu0 %v1008_v51, %s1079_s25  ;;  %v930_v56 = vpack.c.bf16 %v287_v54, %v256_v31  ;;  %v1018_v57 = vpack.i.bf16 %v288_v55, %v287_v54 }
 0x10e   : > { %1024 = vrot.lane.b32.xlu1 %v1023_v52, %s1079_s25  ;;  %915 = vmatpush1.bf16.msra.mxu0 %v914_v53 }
 0x10f   : > { %931 = vmatpush1.bf16.msra.mxu1 %v930_v56 }
 0x111   : > { %1019 = vrot.lane.b32.xlu0 %v1018_v57, %s1079_s25 }
 0x16f   : > { %v270_v59 = vpop.permute.xlu1 %269 }
 0x173   : > { %v282_v61 = vpop.permute.xlu1 %281  ;;  %v264_v62 = vpop.permute.xlu0 %263 }
 0x174   : > { %v295_v63 = vsel %vm283_vm1, %v282_v61, %v264_v62  ;;  %v292_v0 = vsel %vm283_vm1, %v264_v62, %v270_v59 }
 0x175   : > { %v918_v1 = vpack.c.bf16 %v295_v63, %v294_v48  ;;  %300 = vrot.lane.b32.xlu0 %v295_v63, %s1079_s25  ;;  %v916_v2 = vpack.c.bf16 %v292_v0, %v291_v37  ;;  %306 = vrot.lane.b32.xlu1 %v292_v0, %s1079_s25 }
 0x177   : > { %v276_v3 = vpop.permute.xlu0 %275  ;;  %917 = vmatprep.subr.bf16.mxu0 %v916_v2 }
 0x178   : > { %919 = vmatpush1.bf16.msra.mxu0 %v918_v1  ;;  %v289_v6 = vsel %vm283_vm1, %v270_v59, %v276_v3  ;;  %v286_v7 = vsel %vm283_vm1, %v276_v3, %v282_v61 }
 0x179   : > { %v934_v8 = vpack.c.bf16 %v289_v6, %v288_v55  ;;  %312 = vrot.lane.b32.xlu0 %v289_v6, %s1079_s25  ;;  %v932_v9 = vpack.c.bf16 %v286_v7, %v285_v49  ;;  %318 = vrot.lane.b32.xlu1 %v286_v7, %s1079_s25 }
 0x17b   : > { %933 = vmatprep.subr.bf16.mxu1 %v932_v9  ;;  %v1015_v11 = vpop.permute.xlu1 %1014 }
 0x17c   : > { %935 = vmatpush1.bf16.msra.mxu1 %v934_v8  ;;  %v1017_v13 = vunpack.i.h.bf16 %v1015_v11  ;;  %v1016_v14 = vunpack.i.l.bf16 %v1015_v11  ;;  %v525_v8 = vshrl.u32 %v240_v4, 7 }
 0x17d   : > { %335 = vperm.xlu0 %1028, %v225_v10   ;;  %v522_v10 = vld [vmem:[%s1360_s4] sm:$0xf] }
 0x17e   : > { %v526_v9 = vsub.s32 0, %v525_v8 }
 0x17f   : > { %v1010_v12 = vpop.permute.xlu0 %1009 }
 0x180   : > { %v1012_v15 = vunpack.i.h.bf16 %v1010_v12  ;;  %v1011_v16 = vunpack.i.l.bf16 %v1010_v12  ;;  %v1025_v17 = vpop.permute.xlu1 %1024 }
 0x181   : > { %v1027_v18 = vunpack.i.h.bf16 %v1025_v17  ;;  %v1026_v19 = vunpack.i.l.bf16 %v1025_v17 }
 0x182   : > { %v326_v20 = vsel %vm283_vm1, %v1011_v16, %v1016_v14  ;;  %v327_v21 = vsel %vm283_vm1, %v1012_v15, %v1017_v13 }
 0x183   : > { %v1020_v22 = vpop.permute.xlu0 %1019  ;;  %v920_v23 = vpack.c.bf16 %v327_v21, %v326_v20  ;;  %v329_v24 = vsel %vm283_vm1, %v1026_v19, %v1011_v16  ;;  %v330_v25 = vsel %vm283_vm1, %v1027_v18, %v1012_v15  ;;  %v534_v15 = vsub.s32 2, %v525_v8 }
 0x184   : > { %v1022_v26 = vunpack.i.h.bf16 %v1020_v22  ;;  %v1021_v27 = vunpack.i.l.bf16 %v1020_v22  ;;  %v922_v28 = vpack.c.bf16 %v330_v25, %v329_v24  ;;  %v538_v22 = vsub.s32 3, %v525_v8 }
 0x185   : > { %921 = vmatprep.subr.bf16.mxu0 %v920_v23  ;;  %v535_v21 = vrot.slane %v522_v10, %v534_v15 }
 0x186   : > { %923 = vmatpush1.bf16.msra.mxu0 %v922_v28  ;;  %v320_v29 = vsel %vm283_vm1, %v1021_v27, %v1026_v19  ;;  %v321_v30 = vsel %vm283_vm1, %v1022_v26, %v1027_v18  ;;  %v323_v31 = vsel %vm283_vm1, %v1016_v14, %v1021_v27  ;;  %v324_v32 = vsel %vm283_vm1, %v1017_v13, %v1022_v26 }
 0x187   : > { %v936_v33 = vpack.c.bf16 %v321_v30, %v320_v29  ;;  %v938_v34 = vpack.c.bf16 %v324_v32, %v323_v31  ;;  %v527_v13 = vrot.slane %v522_v10, %v526_v9  ;;  %v530_v14 = vsub.s32 1, %v525_v8 }
 0x188   : > { %v539_v31 = vrot.slane %v522_v10, %v538_v22 }
 0x189   : > { %937 = vmatprep.subr.bf16.mxu1 %v936_v33  ;;  %v531_v4 = vrot.slane %v522_v10, %v530_v14 }
 0x18a   : > { %939 = vmatpush1.bf16.msra.mxu1 %v938_v34 }
 0x1e7   : > { %v301_v35 = vpop.permute.xlu0 %300  ;;  %v307_v36 = vpop.permute.xlu1 %306 }
 0x1e8   : > { %v328_v37 = vsel %vm283_vm1, %v301_v35, %v307_v36 }
 0x1e9   : > { %358 = vmatprep.subr.mxu0 %v328_v37 }
 0x1eb   : > { %v313_v38 = vpop.permute.xlu0 %312  ;;  %v319_v39 = vpop.permute.xlu1 %318 }
 0x1ec   : > { %v331_v41 = vsel %vm283_vm1, %v319_v39, %v301_v35  ;;  %v322_v42 = vsel %vm283_vm1, %v313_v38, %v319_v39  ;;  %v325_v43 = vsel %vm283_vm1, %v307_v36, %v313_v38 }
 0x1ed   : > { %359 = vmatpush1.msra.mxu0 %v331_v41  ;;  %429 = vmatprep.subr.mxu1 %v322_v42 }
 0x1ee   : > { %898 = vmatmul.mubr.msk.f32.vlgmr.msra.gmra.mrb[0].mxu0 %vm338_vm2, %v332_v40  ;;  %430 = vmatpush1.msra.mxu1 %v325_v43 }
 0x1ef   : > { %899 = vmatmul.mubr.msk.f32.vlgmr.msra.gmra.mrb[0].mxu1 %vm338_vm2, %v332_v40  ;;  %728 = vmatprep.mubr.f32.mxu0 %v1080_v58 }
 0x1f0   : > { %805 = vmatprep.mubr.f32.mxu1 %v1080_v58 }
 0x1fc   : > { %v336_v44 = vpop.permute.xlu0 %335 }
 0x2c1   : > { %v408_v45 = vpop.f32.mrb[0].mxu0 }
 0x2c2   : > { %v409_v46 = vadd.f32 %v408_v45, %v336_v44  ;;  %v410_v47 = vpop.f32.mrb[1].mxu0  ;;  %v479_v48 = vpop.f32.mrb[0].mxu1 }
 0x2c3   : > { %v480_v49 = vadd.f32 %v479_v48, %v336_v44  ;;  %v481_v50 = vpop.f32.mrb[1].mxu1  ;;  %v411_v52 = vadd.f32 %v410_v47, %v336_v44 }
 0x2c4   : > { %v484_v51 = vmax.f32 %v409_v46, 0.0  ;;  %v482_v55 = vadd.f32 %v481_v50, %v336_v44 }
 0x2c5   : > { %v486_v53 = vmax.f32 %v480_v49, 0.0  ;;  %v485_v54 = vmax.f32 %v411_v52, 0.0 }
 0x2c6   : > { %488 = vrot.lane.b32.xlu1 %v484_v51, %s1082_s30  ;;  %v487_v56 = vmax.f32 %v482_v55, 0.0 }
 0x2c7   : > { %492 = vrot.lane.b32.xlu0 %v486_v53, %s1082_s30 }
 0x2ca   : > { %490 = vrot.lane.b32.xlu1 %v485_v54, %s1082_s30 }
 0x2ce   : > { %494 = vrot.lane.b32.xlu1 %v487_v56, %s1082_s30 }
 0x338   : > { %v489_v57 = vpop.permute.xlu1 %488 }
 0x339   : > { %v493_v59 = vpop.permute.xlu0 %492 }
 0x33c   : > { %v491_v60 = vpop.permute.xlu1 %490 }
 0x33d   : > { %v498_v61 = vsel %vm496_vm3, %v491_v60, %v493_v59  ;;  %v499_v62 = vsel %vm496_vm3, %v489_v57, %v491_v60 }
 0x33e   : > { %v501_v63 = vmax.f32 %v484_v51, %v499_v62  ;;  %v502_v0 = vmax.f32 %v485_v54, %v498_v61 }
 0x340   : > { %505 = vrot.lane.b32.xlu0 %v501_v63, %s1083_s6  ;;  %507 = vrot.lane.b32.xlu1 %v502_v0, %s1083_s6  ;;  %v495_v1 = vpop.permute.xlu1 %494 }
 0x341   : > { %v497_v2 = vsel %vm496_vm3, %v493_v59, %v495_v1  ;;  %v500_v3 = vsel %vm496_vm3, %v495_v1, %v489_v57 }
 0x342   : > { %v503_v6 = vmax.f32 %v486_v53, %v497_v2  ;;  %v504_v7 = vmax.f32 %v487_v56, %v500_v3 }
 0x344   : > { %511 = vrot.lane.b32.xlu1 %v504_v7, %s1083_s6  ;;  %509 = vrot.lane.b32.xlu0 %v503_v6, %s1083_s6 }
 0x3b2   : > { %v506_v11 = vpop.permute.xlu0 %505  ;;  %v508_v12 = vpop.permute.xlu1 %507 }
 0x3b3   : > { %v516_v16 = vsel %vm513_vm4, %v506_v11, %v508_v12 }
 0x3b4   : > { %v518_v17 = vmax.f32 %v501_v63, %v516_v16 }
 0x3b6   : > { %v510_v18 = vpop.permute.xlu0 %509  ;;  %v512_v19 = vpop.permute.xlu1 %511  ;;  %v544_v20 = vmul.f32 %v527_v13, %v518_v17 }
 0x3b7   : > { %v515_v23 = vsel %vm513_vm4, %v508_v12, %v510_v18  ;;  %v514_v24 = vsel %vm513_vm4, %v510_v18, %v512_v19  ;;  %v517_v25 = vsel %vm513_vm4, %v512_v19, %v506_v11 }
 0x3b8   : > { %v519_v26 = vmax.f32 %v502_v0, %v515_v23  ;;  %v520_v27 = vmax.f32 %v503_v6, %v514_v24  ;;  %548 = vrot.lane.b32.xlu0 %v544_v20, %s1084_s9  ;;  %v521_v28 = vmax.f32 %v504_v7, %v517_v25 }
 0x3ba   : > { %v545_v29 = vmul.f32 %v531_v4, %v519_v26  ;;  %v546_v30 = vmul.f32 %v535_v21, %v520_v27  ;;  %v547_v32 = vmul.f32 %v539_v31, %v521_v28 }
 0x3bc   : > { %550 = vrot.lane.b32.xlu1 %v545_v29, %s1084_s9  ;;  %552 = vrot.lane.b32.xlu0 %v546_v30, %s1084_s9 }
 0x3c0   : > { %554 = vrot.lane.b32.xlu1 %v547_v32, %s1084_s9 }
 0x42a   : > { %v549_v33 = vpop.permute.xlu0 %548 }
 0x42e   : > { %v551_v34 = vpop.permute.xlu1 %550  ;;  %v553_v35 = vpop.permute.xlu0 %552 }
 0x42f   : > { %v559_v36 = vsel %vm556_vm5, %v549_v33, %v551_v34  ;;  %v558_v38 = vsel %vm556_vm5, %v551_v34, %v553_v35 }
 0x430   : > { %563 = vrot.lane.b32.xlu1 %v559_v36, %s1084_s9  ;;  %v940_v37 = vpack.c.bf16 %v559_v36, %v545_v29  ;;  %v958_v44 = vpack.c.bf16 %v558_v38, %v546_v30  ;;  %v1034_v45 = vpack.i.bf16 %v559_v36, %v545_v29  ;;  %v1039_v48 = vpack.i.bf16 %v558_v38, %v546_v30 }
 0x432   : > { %941 = vmatprep.subr.bf16.mxu0 %v940_v37  ;;  %v555_v39 = vpop.permute.xlu1 %554 }
 0x433   : > { %v560_v40 = vsel %vm556_vm5, %v555_v39, %v549_v33  ;;  %v557_v41 = vsel %vm556_vm5, %v553_v35, %v555_v39  ;;  %v226_v35 = vld [vmem:[%s1359_s3 + $0x10] sm:$0xff] }
 0x434   : > { %561 = vrot.lane.b32.xlu0 %v560_v40, %s1084_s9  ;;  %v942_v42 = vpack.c.bf16 %v560_v40, %v544_v20  ;;  %567 = vrot.lane.b32.xlu1 %v557_v41, %s1084_s9  ;;  %v956_v43 = vpack.c.bf16 %v557_v41, %v547_v32  ;;  %v1029_v46 = vpack.i.bf16 %v560_v40, %v544_v20 }
 0x435   : > { %v1044_v47 = vpack.i.bf16 %v557_v41, %v547_v32 }
 0x436   : > { %943 = vmatpush1.bf16.msra.mxu0 %v942_v42  ;;  %957 = vmatprep.subr.bf16.mxu1 %v956_v43  ;;  %v227_v42 = vld [vmem:[%s1359_s3 + $0x18] sm:$0xff] }
 0x437   : > { %959 = vmatpush1.bf16.msra.mxu1 %v958_v44 }
 0x438   : > { %565 = vrot.lane.b32.xlu0 %v558_v38, %s1084_s9  ;;  %1035 = vrot.lane.b32.xlu1 %v1034_v45, %s1085_s10 }
 0x43c   : > { %1030 = vrot.lane.b32.xlu0 %v1029_v46, %s1085_s10  ;;  %1045 = vrot.lane.b32.xlu1 %v1044_v47, %s1085_s10 }
 0x440   : > { %1040 = vrot.lane.b32.xlu0 %v1039_v48, %s1085_s10 }
 0x4a2   : > { %v564_v49 = vpop.permute.xlu1 %563 }
 0x4a6   : > { %v562_v50 = vpop.permute.xlu0 %561  ;;  %v568_v51 = vpop.permute.xlu1 %567 }
 0x4a7   : > { %v571_v52 = vsel %vm556_vm5, %v562_v50, %v564_v49  ;;  %v572_v53 = vsel %vm556_vm5, %v568_v51, %v562_v50 }
 0x4a8   : > { %583 = vrot.lane.b32.xlu1 %v571_v52, %s1085_s10  ;;  %577 = vrot.lane.b32.xlu0 %v572_v53, %s1085_s10 }
 0x4aa   : > { %v566_v54 = vpop.permute.xlu0 %565  ;;  %v1036_v55 = vpop.permute.xlu1 %1035 }
 0x4ab   : > { %v570_v56 = vsel %vm556_vm5, %v564_v49, %v566_v54  ;;  %v569_v57 = vsel %vm556_vm5, %v566_v54, %v568_v51  ;;  %v1038_v59 = vunpack.i.h.bf16 %v1036_v55  ;;  %v1037_v60 = vunpack.i.l.bf16 %v1036_v55 }
 0x4ac   : > { %589 = vrot.lane.b32.xlu0 %v570_v56, %s1085_s10  ;;  %595 = vrot.lane.b32.xlu1 %v569_v57, %s1085_s10 }
 0x4ae   : > { %v1031_v61 = vpop.permute.xlu0 %1030  ;;  %v1046_v62 = vpop.permute.xlu1 %1045 }
 0x4af   : > { %v1033_v63 = vunpack.i.h.bf16 %v1031_v61  ;;  %v1032_v0 = vunpack.i.l.bf16 %v1031_v61  ;;  %v1048_v1 = vunpack.i.h.bf16 %v1046_v62  ;;  %v1047_v2 = vunpack.i.l.bf16 %v1046_v62 }
 0x4b1   : > { %v607_v3 = vsel %vm597_vm6, %v1047_v2, %v1032_v0  ;;  %v608_v6 = vsel %vm597_vm6, %v1048_v1, %v1033_v63  ;;  %v604_v7 = vsel %vm597_vm6, %v1032_v0, %v1037_v60  ;;  %v605_v8 = vsel %vm597_vm6, %v1033_v63, %v1038_v59 }
 0x4b2   : > { %v1041_v9 = vpop.permute.xlu0 %1040  ;;  %v1049_v10 = vpack.i.bf16 %v608_v6, %v607_v3  ;;  %v946_v11 = vpack.c.bf16 %v607_v3, %v572_v53  ;;  %v1054_v12 = vpack.i.bf16 %v605_v8, %v604_v7  ;;  %v944_v13 = vpack.c.bf16 %v604_v7, %v571_v52  ;;  %v646_v3 = vld [vmem:[%s1358_s2] sm:$0xff] }
 0x4b3   : > { %v1043_v14 = vunpack.i.h.bf16 %v1041_v9  ;;  %v1042_v15 = vunpack.i.l.bf16 %v1041_v9  ;;  %v647_v9 = vld [vmem:[%s1358_s2 + $0x8] sm:$0xff] }
 0x4b4   : > { %1050 = vrot.lane.b32.xlu0 %v1049_v10, %s1085_s10  ;;  %1055 = vrot.lane.b32.xlu1 %v1054_v12, %s1085_s10 }
 0x4b5   : > { %945 = vmatprep.subr.bf16.mxu0 %v944_v13  ;;  %v598_v16 = vsel %vm597_vm6, %v1042_v15, %v1047_v2  ;;  %v599_v17 = vsel %vm597_vm6, %v1043_v14, %v1048_v1  ;;  %v601_v18 = vsel %vm597_vm6, %v1037_v60, %v1042_v15  ;;  %v602_v19 = vsel %vm597_vm6, %v1038_v59, %v1043_v14 }
 0x4b6   : > { %947 = vmatpush1.bf16.msra.mxu0 %v946_v11  ;;  %v960_v20 = vpack.c.bf16 %v598_v16, %v569_v57  ;;  %v1064_v4 = vpack.i.bf16 %v599_v17, %v598_v16  ;;  %v1059_v21 = vpack.i.bf16 %v602_v19, %v601_v18  ;;  %v962_v22 = vpack.c.bf16 %v601_v18, %v570_v56 }
 0x4b8   : > { %961 = vmatprep.subr.bf16.mxu1 %v960_v20  ;;  %1065 = vrot.lane.b32.xlu1 %v1064_v4, %s1085_s10 }
 0x4b9   : > { %1060 = vrot.lane.b32.xlu0 %v1059_v21, %s1085_s10  ;;  %963 = vmatpush1.bf16.msra.mxu1 %v962_v22 }
 0x51a   : > { %v578_v23 = vpop.permute.xlu0 %577  ;;  %v584_v24 = vpop.permute.xlu1 %583 }
 0x51b   : > { %v606_v25 = vsel %vm597_vm6, %v578_v23, %v584_v24 }
 0x51c   : > { %v948_v26 = vpack.c.bf16 %v606_v25, %v605_v8  ;;  %620 = vrot.lane.b32.xlu1 %v606_v25, %s1085_s10 }
 0x51e   : > { %v590_v27 = vpop.permute.xlu0 %589  ;;  %v596_v28 = vpop.permute.xlu1 %595  ;;  %949 = vmatprep.subr.bf16.mxu0 %v948_v26 }
 0x51f   : > { %v603_v29 = vsel %vm597_vm6, %v584_v24, %v590_v27  ;;  %v600_v30 = vsel %vm597_vm6, %v590_v27, %v596_v28  ;;  %v609_v31 = vsel %vm597_vm6, %v596_v28, %v578_v23 }
 0x520   : > { %v966_v32 = vpack.c.bf16 %v603_v29, %v602_v19  ;;  %v964_v33 = vpack.c.bf16 %v600_v30, %v599_v17  ;;  %632 = vrot.lane.b32.xlu1 %v600_v30, %s1085_s10  ;;  %v950_v34 = vpack.c.bf16 %v609_v31, %v608_v6  ;;  %614 = vrot.lane.b32.xlu0 %v609_v31, %s1085_s10 }
 0x522   : > { %951 = vmatpush1.bf16.msra.mxu0 %v950_v34  ;;  %965 = vmatprep.subr.bf16.mxu1 %v964_v33 }
 0x523   : > { %967 = vmatpush1.bf16.msra.mxu1 %v966_v32 }
 0x524   : > { %626 = vrot.lane.b32.xlu0 %v603_v29, %s1085_s10  ;;  %655 = vperm.xlu1 %1069, %v227_v42  }
 0x526   : > { %v1051_v36 = vpop.permute.xlu0 %1050  ;;  %v1056_v37 = vpop.permute.xlu1 %1055 }
 0x527   : > { %v1053_v38 = vunpack.i.h.bf16 %v1051_v36  ;;  %v1052_v39 = vunpack.i.l.bf16 %v1051_v36  ;;  %v1058_v40 = vunpack.i.h.bf16 %v1056_v37  ;;  %v1057_v41 = vunpack.i.l.bf16 %v1056_v37 }
 0x528   : > { %650 = vperm.xlu0 %1028, %v226_v35  }
 0x529   : > { %v640_v43 = vsel %vm597_vm6, %v1052_v39, %v1057_v41  ;;  %v641_v44 = vsel %vm597_vm6, %v1053_v38, %v1058_v40 }
 0x52a   : > { %v1066_v45 = vpop.permute.xlu1 %1065  ;;  %v952_v46 = vpack.c.bf16 %v641_v44, %v640_v43 }
 0x52b   : > { %v1068_v47 = vunpack.i.h.bf16 %v1066_v45  ;;  %v1067_v48 = vunpack.i.l.bf16 %v1066_v45  ;;  %v1061_v49 = vpop.permute.xlu0 %1060 }
 0x52c   : > { %v1063_v50 = vunpack.i.h.bf16 %v1061_v49  ;;  %v1062_v51 = vunpack.i.l.bf16 %v1061_v49  ;;  %953 = vmatprep.subr.bf16.mxu0 %v952_v46 }
 0x52d   : > { %v644_v52 = vsel %vm597_vm6, %v1068_v47, %v1053_v38  ;;  %v643_v53 = vsel %vm597_vm6, %v1067_v48, %v1052_v39 }
 0x52e   : > { %v954_v54 = vpack.c.bf16 %v644_v52, %v643_v53  ;;  %v638_v55 = vsel %vm597_vm6, %v1058_v40, %v1063_v50  ;;  %v637_v56 = vsel %vm597_vm6, %v1057_v41, %v1062_v51  ;;  %v634_v57 = vsel %vm597_vm6, %v1062_v51, %v1067_v48 }
 0x52f   : > { %v970_v59 = vpack.c.bf16 %v638_v55, %v637_v56  ;;  %v635_v60 = vsel %vm597_vm6, %v1063_v50, %v1068_v47 }
 0x530   : > { %955 = vmatpush1.bf16.msra.mxu0 %v954_v54  ;;  %v968_v61 = vpack.c.bf16 %v635_v60, %v634_v57 }
 0x532   : > { %969 = vmatprep.subr.bf16.mxu1 %v968_v61 }
 0x533   : > { %971 = vmatpush1.bf16.msra.mxu1 %v970_v59 }
 0x58e   : > { %v621_v62 = vpop.permute.xlu1 %620 }
 0x592   : > { %v633_v63 = vpop.permute.xlu1 %632  ;;  %v615_v0 = vpop.permute.xlu0 %614 }
 0x593   : > { %v645_v1 = vsel %vm597_vm6, %v633_v63, %v615_v0  ;;  %v642_v2 = vsel %vm597_vm6, %v615_v0, %v621_v62 }
 0x594   : > { %680 = vmatprep.subr.mxu0 %v642_v2 }
 0x595   : > { %681 = vmatpush1.msra.mxu0 %v645_v1 }
 0x596   : > { %900 = vmatmul.mubr.msk.f32.vlgmr.msra.gmra.mrb[2].mxu0 %vm338_vm2, %v646_v3  ;;  %v627_v6 = vpop.permute.xlu0 %626 }
 0x597   : > { %v639_v7 = vsel %vm597_vm6, %v621_v62, %v627_v6  ;;  %v636_v8 = vsel %vm597_vm6, %v627_v6, %v633_v63  ;;  %734 = vmatprep.mubr.f32.mxu0 %v1080_v58 }
 0x598   : > { %757 = vmatprep.subr.mxu1 %v636_v8 }
 0x599   : > { %758 = vmatpush1.msra.mxu1 %v639_v7 }
 0x59a   : > { %902 = vmatmul.mubr.msk.f32.vlgmr.msra.gmra.mrb[2].mxu1 %vm338_vm2, %v646_v3  ;;  %901 = vmatmul.mubr.msk.f32.gmra.mrb[4].mxu0 %vm338_vm2, %v647_v9 }
 0x59b   : > { %811 = vmatprep.mubr.f32.mxu1 %v1080_v58 }
 0x59e   : > { %903 = vmatmul.mubr.msk.f32.gmra.mrb[4].mxu1 %vm338_vm2, %v647_v9 }
 0x5a3   : > { %v656_v14 = vpop.permute.xlu1 %655 }
 0x5a7   : > { %v651_v10 = vpop.permute.xlu0 %650 }
 0x669   : > { %v730_v5 = vpop.f32.mrb[2].mxu0 }
 0x66a   : > { %v731_v11 = vadd.f32 %v730_v5, %v651_v10  ;;  %v732_v12 = vpop.f32.mrb[3].mxu0 }
 0x66b   : > { %v733_v13 = vadd.f32 %v732_v12, %v651_v10 }
 0x66c   : > { %v818_v15 = vmax.f32 %v731_v11, 0.0 }
 0x66d   : > { %v819_v16 = vmax.f32 %v733_v13, 0.0  ;;  %v807_v17 = vpop.f32.mrb[2].mxu1  ;;  %v736_v18 = vpop.f32.mrb[4].mxu0 }
 0x66e   : > { %826 = vst [vmem:[%s224_s24] sm:$0xff] %v818_v15  ;;  %v808_v19 = vadd.f32 %v807_v17, %v651_v10  ;;  %v809_v58 = vpop.f32.mrb[3].mxu1  ;;  %v737_v20 = vadd.f32 %v736_v18, %v656_v14  ;;  %v738_v4 = vpop.f32.mrb[5].mxu0 }
 0x66f   : > { %827 = vst [vmem:[%s224_s24 + $0x8] sm:$0xff] %v819_v16  ;;  %v810_v21 = vadd.f32 %v809_v58, %v651_v10  ;;  %v739_v22 = vadd.f32 %v738_v4, %v656_v14 }
 0x670   : > { %v820_v23 = vmax.f32 %v808_v19, 0.0  ;;  %v822_v24 = vmax.f32 %v737_v20, 0.0 }
 0x671   : > { %v821_v25 = vmax.f32 %v810_v21, 0.0  ;;  %v823_v26 = vmax.f32 %v739_v22, 0.0  ;;  %v813_v27 = vpop.f32.mrb[4].mxu1 }
 0x672   : > { %828 = vst [vmem:[%s224_s24 + $0x10] sm:$0xff] %v820_v23  ;;  %830 = vst [vmem:[%s224_s24 + $0x20] sm:$0xff] %v822_v24  ;;  %v814_v28 = vadd.f32 %v813_v27, %v656_v14  ;;  %v815_v29 = vpop.f32.mrb[5].mxu1 }
 0x673   : > { %829 = vst [vmem:[%s224_s24 + $0x18] sm:$0xff] %v821_v25  ;;  %831 = vst [vmem:[%s224_s24 + $0x28] sm:$0xff] %v823_v26  ;;  %v816_v30 = vadd.f32 %v815_v29, %v656_v14 }
 0x674   : > { %v824_v31 = vmax.f32 %v814_v28, 0.0 }
 0x675   : > { %v825_v32 = vmax.f32 %v816_v30, 0.0 }
 0x676   : > { %832 = vst [vmem:[%s224_s24 + $0x30] sm:$0xff] %v824_v31 }
 0x677   : > { %833 = vst [vmem:[%s224_s24 + $0x38] sm:$0xff] %v825_v32 }
 0x678 PF: > { %s15_s18 = sadd.s32 1, %s1076_s18  }
 0x679   : > { %p12_p4 = scmp.ge.s32.totalorder %s15_s18, 4  }
 0x67b   :  { %14 = sbr.rel (!%p12_p4) target bundleno = 1 (0x1), region = 70 }

</bundles_post_ra>
